<compile_context>
chip_gen: v5e
topology: v5e:2x2
jax: 0.10.0
libtpu: 0.0.40
codegen_flags: <defaults>
</compile_context>

<pallas_src>
import jax
import jax.numpy as jnp
from jax.experimental import pallas as pl
from jax.experimental.pallas import tpu as pltpu


def _cdiv(a, b):
    return (a + b - 1) // b


def _channel_attention_kernel(x_ref, w1_ref, b1_ref, w2_ref, b2_ref, o_ref):
    # x_ref: (Nb, C, HW) lane-dense block (H*W on the 128-lane axis).
    # ---- squeeze: global average pool + two 1x1 "convs" (tiny matmuls) ----
    pooled = jnp.mean(x_ref[...].astype(jnp.float32), axis=-1)          # (Nb, C)

    h = jnp.dot(pooled, w1_ref[...], preferred_element_type=jnp.float32)
    h = jnp.maximum(h + b1_ref[...], 0.0)                               # (Nb, Cr)

    s = jnp.dot(h, w2_ref[...], preferred_element_type=jnp.float32)
    s = jax.nn.sigmoid(s + b2_ref[...])                                 # (Nb, C)

    # ---- excitation: fresh read of the VMEM-resident tile, scale, store ----
    x = x_ref[...]
    o_ref[...] = (x * s.astype(x.dtype)[:, :, None]).astype(o_ref.dtype)


def channel_attention(x, w1, b1, w2, b2, *, target_block_bytes=2 * 1024 * 1024):
    """RCAN ChannelAttention forward.

    x: (N, C, H, W); w1: (Cr, C); b1: (Cr,); w2: (C, Cr); b2: (C,)
    Matches: x * Sigmoid(Conv1x1(ReLU(Conv1x1(AvgPool(x)))))
    """
    N, C, H, W = x.shape
    Cr = w1.shape[0]
    HW = H * W

    # Lane-dense layout: H*W on the minor (lane) axis.
    x_r = x.reshape(N, C, HW)

    # Loop-invariant weight transposes belong in the wrapper, not the kernel.
    w1_t = jnp.transpose(w1)             # (C, Cr)
    w2_t = jnp.transpose(w2)             # (Cr, C)
    b1_2d = b1.reshape(1, Cr)
    b2_2d = b2.reshape(1, C)

    # Batch several images per grid step so each step moves MiB-scale data
    # (per-step pipeline overhead ~0.35 us), but keep >= 2 grid steps when
    # N >= 2 so both v7x TensorCores are used on this bandwidth-bound kernel.
    per_image_bytes = C * HW * x.dtype.itemsize
    nb = max(1, min(N, target_block_bytes // max(per_image_bytes, 1)))
    if N >= 2 and _cdiv(N, nb) < 2:
        nb = _cdiv(N, 2)
    nb = int(nb)

    # VMEM budget: double-buffered in + out blocks + f32 temporaries + slack.
    block_bytes = nb * per_image_bytes
    vmem_budget = 4 * block_bytes + 2 * nb * C * HW * 4 + (1 << 20)
    vmem_limit = int(min(64 << 20, max(16 << 20, vmem_budget)))

    cost = pl.CostEstimate(
        flops=int(N * (2 * C * HW + 4 * C * Cr)),      # pool + matmuls + scale
        transcendentals=int(N * C),                     # sigmoid
        bytes_accessed=int(2 * N * C * HW * x.dtype.itemsize
                           + (2 * C * Cr + C + Cr) * 4),
    )

    out = pl.pallas_call(
        _channel_attention_kernel,
        out_shape=jax.ShapeDtypeStruct((N, C, HW), x.dtype),
        grid_spec=pltpu.PrefetchScalarGridSpec(
            num_scalar_prefetch=0,
            grid=(_cdiv(N, nb),),
            in_specs=[
                pl.BlockSpec((nb, C, HW), lambda n: (n, 0, 0)),
                pl.BlockSpec((C, Cr), lambda n: (0, 0)),
                pl.BlockSpec((1, Cr), lambda n: (0, 0)),
                pl.BlockSpec((Cr, C), lambda n: (0, 0)),
                pl.BlockSpec((1, C), lambda n: (0, 0)),
            ],
            out_specs=pl.BlockSpec((nb, C, HW), lambda n: (n, 0, 0)),
        ),
        compiler_params=pltpu.CompilerParams(
            dimension_semantics=("parallel",),
            vmem_limit_bytes=vmem_limit,
        ),
        cost_estimate=cost,
    )(x_r, w1_t, b1_2d, w2_t, b2_2d)

    return out.reshape(N, C, H, W)


def channel_attention_ref(x, w1, b1, w2, b2):
    """Pure-JAX reference matching the PyTorch module."""
    pooled = jnp.mean(x.astype(jnp.float32), axis=(2, 3))               # (N, C)
    h = jnp.maximum(pooled @ w1.T + b1, 0.0)                            # (N, Cr)
    s = jax.nn.sigmoid(h @ w2.T + b2)                                   # (N, C)
    return (x.astype(jnp.float32) * s[:, :, None, None]).astype(x.dtype)


if __name__ == "__main__":
    # Module config: num_features=16, reduction=4 -> Cr = 4
    N, C, H, W = 2, 16, 16, 16
    reduction = 4
    Cr = C // reduction

    key = jax.random.PRNGKey(0)
    kx, k1, k2, k3, k4 = jax.random.split(key, 5)

    x = jax.random.normal(kx, (N, C, H, W), dtype=jnp.float32)
    # Conv2d 1x1 weights squeezed to 2-D.
    w1 = jax.random.normal(k1, (Cr, C), dtype=jnp.float32) * 0.1
    b1 = jax.random.normal(k2, (Cr,), dtype=jnp.float32) * 0.1
    w2 = jax.random.normal(k3, (C, Cr), dtype=jnp.float32) * 0.1
    b2 = jax.random.normal(k4, (C,), dtype=jnp.float32) * 0.1

    out = channel_attention(x, w1, b1, w2, b2)
    out = jax.block_until_ready(out)

    ref = channel_attention_ref(x, w1, b1, w2, b2)
    assert out.shape == (N, C, H, W)
    assert jnp.allclose(out, ref, atol=1e-5, rtol=1e-5), "mismatch vs reference"

    print("KERNEL_OK")
</pallas_src>

<mosaic_0001>
module attributes {stable_mosaic.version = 11 : i64} {
  func.func @_channel_attention_kernel(%arg0: i32, %arg1: memref<1x16x256xf32, #tpu.memory_space<vmem>>, %arg2: memref<16x4xf32, #tpu.memory_space<vmem>>, %arg3: memref<1x4xf32, #tpu.memory_space<vmem>>, %arg4: memref<4x16xf32, #tpu.memory_space<vmem>>, %arg5: memref<1x16xf32, #tpu.memory_space<vmem>>, %arg6: memref<1x16x256xf32, #tpu.memory_space<vmem>>) attributes {dimension_semantics = [#tpu.dimension_semantics<parallel>], iteration_bounds = array<i64: 2>, scalar_prefetch = 0 : i64, scratch_operands = 0 : i64, tpu.core_type = #tpu.core_type<tc>, window_params = [{transform_indices = @transform_0, window_bounds = array<i64: 1, 16, 256>}, {pipeline_mode = #tpu.pipeline_mode<synchronous>, transform_indices = @transform_1, window_bounds = array<i64: 16, 4>}, {pipeline_mode = #tpu.pipeline_mode<synchronous>, transform_indices = @transform_2, window_bounds = array<i64: 1, 4>}, {pipeline_mode = #tpu.pipeline_mode<synchronous>, transform_indices = @transform_3, window_bounds = array<i64: 4, 16>}, {pipeline_mode = #tpu.pipeline_mode<synchronous>, transform_indices = @transform_4, window_bounds = array<i64: 1, 16>}, {transform_indices = @transform_5, window_bounds = array<i64: 1, 16, 256>}]} {
    %c0 = arith.constant 0 : index
    %c0_0 = arith.constant 0 : index
    %c0_1 = arith.constant 0 : index
    %0 = vector.load %arg1[%c0, %c0_0, %c0_1] : memref<1x16x256xf32, #tpu.memory_space<vmem>>, vector<1x16x256xf32>
    %cst = arith.constant dense<0.000000e+00> : vector<1x16xf32>
    %1 = vector.multi_reduction <add>, %0, %cst [2] : vector<1x16x256xf32> to vector<1x16xf32>
    %cst_2 = arith.constant 2.560000e+02 : f32
    %2 = vector.broadcast %cst_2 : f32 to vector<1x16xf32>
    %3 = arith.divf %1, %2 : vector<1x16xf32>
    %c0_3 = arith.constant 0 : index
    %c0_4 = arith.constant 0 : index
    %4 = vector.load %arg2[%c0_3, %c0_4] : memref<16x4xf32, #tpu.memory_space<vmem>>, vector<16x4xf32>
    %cst_5 = arith.constant dense<0.000000e+00> : vector<1x4xf32>
    %5 = tpu.matmul %3, %4, %cst_5 {dimension_numbers = #tpu.dot_dimension_numbers<[1], [0], [0], [1], [0, 0, 1, 1], [], []>} : vector<1x16xf32>, vector<16x4xf32>, vector<1x4xf32> -> vector<1x4xf32>
    %c0_6 = arith.constant 0 : index
    %c0_7 = arith.constant 0 : index
    %6 = vector.load %arg3[%c0_6, %c0_7] : memref<1x4xf32, #tpu.memory_space<vmem>>, vector<1x4xf32>
    %7 = arith.addf %5, %6 : vector<1x4xf32>
    %cst_8 = arith.constant 0.000000e+00 : f32
    %8 = vector.broadcast %cst_8 : f32 to vector<1x4xf32>
    %9 = arith.maximumf %7, %8 : vector<1x4xf32>
    %c0_9 = arith.constant 0 : index
    %c0_10 = arith.constant 0 : index
    %10 = vector.load %arg4[%c0_9, %c0_10] : memref<4x16xf32, #tpu.memory_space<vmem>>, vector<4x16xf32>
    %cst_11 = arith.constant dense<0.000000e+00> : vector<1x16xf32>
    %11 = tpu.matmul %9, %10, %cst_11 {dimension_numbers = #tpu.dot_dimension_numbers<[1], [0], [0], [1], [0, 0, 1, 1], [], []>} : vector<1x4xf32>, vector<4x16xf32>, vector<1x16xf32> -> vector<1x16xf32>
    %c0_12 = arith.constant 0 : index
    %c0_13 = arith.constant 0 : index
    %12 = vector.load %arg5[%c0_12, %c0_13] : memref<1x16xf32, #tpu.memory_space<vmem>>, vector<1x16xf32>
    %13 = arith.addf %11, %12 : vector<1x16xf32>
    %14 = arith.negf %13 : vector<1x16xf32>
    %15 = math.exp %14 : vector<1x16xf32>
    %cst_14 = arith.constant 1.000000e+00 : f32
    %16 = vector.broadcast %cst_14 : f32 to vector<1x16xf32>
    %17 = arith.addf %16, %15 : vector<1x16xf32>
    %18 = arith.divf %16, %17 : vector<1x16xf32>
    %c0_15 = arith.constant 0 : index
    %c0_16 = arith.constant 0 : index
    %c0_17 = arith.constant 0 : index
    %19 = vector.load %arg1[%c0_15, %c0_16, %c0_17] : memref<1x16x256xf32, #tpu.memory_space<vmem>>, vector<1x16x256xf32>
    %20 = vector.shape_cast %18 : vector<1x16xf32> to vector<1x16x1xf32>
    %21 = vector.broadcast %20 : vector<1x16x1xf32> to vector<1x16x256xf32>
    %22 = arith.mulf %19, %21 : vector<1x16x256xf32>
    %c0_18 = arith.constant 0 : index
    %c0_19 = arith.constant 0 : index
    %c0_20 = arith.constant 0 : index
    %23 = vector.load %arg6[%c0_18, %c0_19, %c0_20] : memref<1x16x256xf32, #tpu.memory_space<vmem>>, vector<1x16x256xf32>
    tpu.vector_store %arg6[%c0_18, %c0_19, %c0_20], %22 {strides = array<i32>} : memref<1x16x256xf32, #tpu.memory_space<vmem>>, vector<1x16x256xf32>,
    return
  }
  func.func @transform_0(%arg0: i32) -> (i32, i32, i32) {
    %c0_i32 = arith.constant 0 : i32
    %c0_i32_0 = arith.constant 0 : i32
    %c0_i32_1 = arith.constant 0 : i32
    return %arg0, %c0_i32, %c0_i32_0 : i32, i32, i32
  }
  func.func @transform_1(%arg0: i32) -> (i32, i32) {
    %c0_i32 = arith.constant 0 : i32
    %c0_i32_0 = arith.constant 0 : i32
    %c0_i32_1 = arith.constant 0 : i32
    return %c0_i32, %c0_i32_0 : i32, i32
  }
  func.func @transform_2(%arg0: i32) -> (i32, i32) {
    %c0_i32 = arith.constant 0 : i32
    %c0_i32_0 = arith.constant 0 : i32
    %c0_i32_1 = arith.constant 0 : i32
    return %c0_i32, %c0_i32_0 : i32, i32
  }
  func.func @transform_3(%arg0: i32) -> (i32, i32) {
    %c0_i32 = arith.constant 0 : i32
    %c0_i32_0 = arith.constant 0 : i32
    %c0_i32_1 = arith.constant 0 : i32
    return %c0_i32, %c0_i32_0 : i32, i32
  }
  func.func @transform_4(%arg0: i32) -> (i32, i32) {
    %c0_i32 = arith.constant 0 : i32
    %c0_i32_0 = arith.constant 0 : i32
    %c0_i32_1 = arith.constant 0 : i32
    return %c0_i32, %c0_i32_0 : i32, i32
  }
  func.func @transform_5(%arg0: i32) -> (i32, i32, i32) {
    %c0_i32 = arith.constant 0 : i32
    %c0_i32_0 = arith.constant 0 : i32
    %c0_i32_1 = arith.constant 0 : i32
    return %arg0, %c0_i32, %c0_i32_0 : i32, i32, i32
  }
}

</mosaic_0001>

<bundles_post_ra>
// kernel: tpu_custom_call.1
= control target key start
LH: loop header
LB: loop body
LE: loop exit
PB: predicated region body
PF: predicated region fallthrough
CT: control target
= control target key end

     0   :  { %10 = vsyncpa [#allocation3], 0  ;;  %s834_s0 = inlined_call_operand.hbm [shape: f32[2,16,256], index: 0, kind: input, shape index: {}]   ;;  %s835_s1 = inlined_call_operand.vmem [shape: f32[16,4], index: 1, kind: input, shape index: {}]   ;;  %s836_s2 = inlined_call_operand.vmem [shape: f32[1,4], index: 2, kind: input, shape index: {}]   ;;  %s837_s3 = inlined_call_operand.vmem [shape: f32[4,16], index: 3, kind: input, shape index: {}]   ;;  %s838_s4 = inlined_call_operand.vmem [shape: f32[1,16], index: 4, kind: input, shape index: {}]   ;;  %s839_s5 = inlined_call_operand.hbm [shape: f32[2,16,256], index: 5, kind: output, shape index: {}]  }
   0x1   :  { %12 = vsyncpa [#allocation3 + $0x1], 0 }
   0x2   :  { %13 = vsyncpa [#allocation4], 0 }
   0x3   :  { %15 = vsyncpa [#allocation4 + $0x1], 0  ;;  %s672_s18 = smov 0   ;;  %s674_s19 = smov 0  }
   0x4   :  { %s676_s20 = smov 0   ;;  %s678_s21 = smov 0  }
   0x5 LB: > { %s693_s22 = sadd.s32 4294967295, %s635_s21   ;;  %s459_s23 = sadd.s32 4294967294, %s635_s21   ;;  %s635_s21 = sphi %s678_s21, %s849_s21   ;;  %s631_s20 = sphi %s676_s20, %s848_s20   ;;  %s627_s19 = sphi %s674_s19, %s847_s19   ;;  %s623_s18 = sphi %s672_s18, %s846_s18  }
   0x6   : > { %s697_s24 = sadd.s32 1, %s635_s21   ;;  %s28_s25 = sadd.s32 1, %s631_s20 }
   0x7   : > { %s25_s26 = ssub.s32 %s635_s21, %s697_s24  ;;  %p35_p0 = scmp.ne.s32.totalorder %s631_s20, %s627_s19 }
   0x8   : > { %p26_p1 = scmp.eq.s32.totalorder %s25_s26, 0  ;;  %p36_p2 = scmp.eq.s32.totalorder %s635_s21, 0 }
   0x9   : > { %p41_p3 = scmp.ne.s32.totalorder %s627_s19, %s623_s18  ;;  %p42_p4 = scmp.eq.s32.totalorder %s693_s22, 0 }
   0xa   : > { %s709_s27 = scalar_select %p26_p1, %s631_s20, %s28_s25  }
   0xb   : > { %p711_p5 = por %p36_p2, %p35_p0  ;;  %p715_p6 = por %p42_p4, %p41_p3 }
   0xc   : > { %p149_p7 = scmp.eq.s32.totalorder %s693_s22, 1  ;;  %p155_p8 = scmp.eq.s32.totalorder %s459_s23, 1 }
   0xd   : > { %p491_p10 = scmp.lt.s32.totalorder %s635_s21, 2  ;;  %s187_s7 = sand.u32 1, %s631_s20  }
   0xe   : > { %p722_p11 = por %p149_p7, %p35_p0  ;;  %p726_p12 = por %p155_p8, %p41_p3 }
   0xf   : > { %s477_s8 = sshll.u32 %s635_s21, 5  ;;  %s462_s9 = sshll.u32 %s187_s7, 5 }
  0x10   : > { %s196_s12 = scalar_lea.hbm %s834_s0, %s477_s8  ;;  %s191_s14 = scalar_lea.vmem [#allocation2], %s462_s9 }
  0x11   : > { %s197_s13 = sshll.u32 %s196_s12, 4  ;;  %s199_s15 = sshll.u32 %s191_s14, 4  ;;  %s198_s13 = int_to_ptr.hbm [resolvable:$true] %s197_s13  ;;  %s200_s15 = int_to_ptr.vmem [resolvable:$true] %s199_s15 }
  0x12   : > { %p737_p13 = pnand %p491_p10, %p711_p5  ;;  %p465_p0 = scmp.ge.s32.totalorder %s635_s21, 1 }
  0x13   : > { %p207_p1 = scmp.lt.s32.totalorder %s635_s21, 3  ;;  %s188_s17 = scalar_lea.sflag [#allocation3], %s187_s7 }
  0x14   : > { %s539_s23 = sshra.s32 %s198_s13, 4  ;;  %p543_p3 = pneg %p737_p13  ;;  %s540_s23 = int_to_ptr.hbm [resolvable:$true] %s539_s23 }
  0x15   : > { %s541_s25 = scalar_lea.hbm %s540_s23, 32  ;;  %s546_s28 = scalar_lea.hbm %s834_s0, 64 }
  0x16   : > { %p542_p2 = scmp.ne.s32.totalorder %s540_s23, %s541_s25  ;;  %p547_p5 = scmp.lt.s32.totalorder %s540_s23, %s834_s0 }
  0x17   : > { %p548_p8 = scmp.lt.s32.totalorder %s546_s28, %s541_s25 }
  0x18   : > { %p544_p4 = pnand %p543_p3, %p542_p2 }
  0x19   : > { %p549_p10 = por %p548_p8, %p547_p5 }
  0x1a   : > { %p545_p7 = pneg %p544_p4 }
  0x1c   : > { %p550_p9 = pnand %p549_p10, %p545_p7 }
  0x1e   : > { %553 = shalt.err (!%p550_p9)
}
  0x1f   : > { %s637_s7 = smov 256   ;;  %s638_s11 = smov 16  }
  0x20   : > { %486 = dma.hbm_to_vmem [thread:$0]  (!%p737_p13), %s198_s13, 512, %s200_s15, %s188_s17, %s637_s7, %s637_s7, %s638_s11  }
  0x21   : > { %p208_p2 = pnand %p465_p0, %p207_p1 }
  0x22   : > { %s758_s12 = sand.u32 (!%p208_p2), 1, %s627_s19  }
  0x23   : > { %211 = sbr.rel (%p208_p2) target bundleno = 599 (0x257), region = 40  ;;  %s466_s14 = sshll.u32 (!%p208_p2), %s758_s12, 5 }
  0x24   : > { %s214_s23 = scalar_lea.sflag (!%p208_p2), [#allocation3], %s758_s12  ;;  %s217_s25 = scalar_lea.vmem (!%p208_p2), [#allocation2], %s466_s14 }
  0x28   : > { %614 = dma.done.wait (%p715_p6), %s214_s23, 512  }
  0x29   : > { %616 = vsyncadd (%p715_p6), %s214_s23, 4294966784  ;;  %v768_v0 = vld [vmem:[%s217_s25] sm:$0xff]  ;;  %v770_v1 = vld [vmem:[%s217_s25 + $0x8] sm:$0xff]  ;;  %v639_v7 = vmov 256.0   ;;  %v269_v15 = vlaneseq  ;;  %vm274_vm1 = vcmask 130112   ;;  %vm276_vm2 = vcmask 130048  }
  0x2a   : > { %v249_v2 = vadd.f32 %v770_v1, %v768_v0  ;;  %v774_v3 = vld [vmem:[%s217_s25 + $0x10] sm:$0xff]  ;;  %v776_v4 = vld [vmem:[%s217_s25 + $0x18] sm:$0xff]  ;;  %v265_v6 = vld [vmem:[%s835_s1 + $0x8] sm:$0xff]  ;;  %533 = vrcp.f32 %v639_v7  ;;  %vm306_vm3 = vcmask 1043456   ;;  %vm302_vm4 = vcmask 31744   ;;  %s244_s7 = scalar_lea.vmem [#allocation5], %s466_s14 }
  0x2b   : > { %v252_v5 = vadd.f32 %v776_v4, %v774_v3  ;;  %293 = vmatpush.msra.mxu0 %v265_v6  ;;  %v264_v8 = vld [vmem:[%s835_s1] sm:$0xff]  ;;  %v270_v17 = vand.u32 127, %v269_v15  ;;  %v351_v30 = vshrl.u32 %v269_v15, 7  ;;  %s478_s11 = sshll.u32 %s693_s22, 5  ;;  %s383_s15 = sshll.u32 %s244_s7, 4  ;;  %s384_s15 = int_to_ptr.vmem [resolvable:$true] %s383_s15 }
  0x2c   : > { %250 = vadd.xlane.f32.xlu0 %v249_v2  ;;  %v300_v25 = vld [vmem:[%s837_s3] sm:$0xf]  ;;  %s382_s13 = scalar_lea.hbm %s839_s5, %s478_s11  ;;  %s371_s14 = scalar_lea.sflag [#allocation4], %s758_s12 }
  0x2d   : > { %294 = vmatpush.msra.mxu0 %v264_v8  ;;  %v272_v19 = vadd.s32 4294967288, %v270_v17  ;;  %469 = vmatpush.msk.msra.mxu1 %vm306_vm3, %v300_v25  ;;  %v266_v26 = vld [vmem:[%s836_s2] sm:$0x1]  ;;  %v358_v31 = vadd.s32 8, %v351_v30  ;;  %s385_s29 = sshll.u32 %s382_s13, 4  ;;  %s589_s8 = scalar_lea.hbm %s839_s5, 64  ;;  %s386_s29 = int_to_ptr.hbm [resolvable:$true] %s385_s29 }
  0x2e   : > { %530 = vset.pattern.permute.xlu1 %v351_v30  ;;  %v301_v32 = vld [vmem:[%s838_s4] sm:$0x1]  ;;  %s583_s16 = sshra.s32 %s386_s29, 4  ;;  %s584_s16 = int_to_ptr.hbm [resolvable:$true] %s583_s16 }
  0x2f   : > { %532 = vset.pattern.permute.xlu0 %v358_v31  ;;  %s585_s22 = scalar_lea.hbm %s584_s16, 32  ;;  %p590_p0 = scmp.lt.s32.totalorder %s584_s16, %s839_s5 }
  0x30   : > { %v534_v9 = vpop.eup %533  ;;  %p586_p6 = scmp.ne.s32.totalorder %s584_s16, %s585_s22  ;;  %p591_p1 = scmp.lt.s32.totalorder %s589_s8, %s585_s22 }
  0x31   : > { %v256_v10 = vmul.f32 256.0, %v534_v9  ;;  %vm260_vm0 = vweird.f32 %v534_v9 }
  0x32   : > { %p587_p9 = pnand %p586_p6, %p722_p11  ;;  %p592_p3 = por %p591_p1, %p590_p0 }
  0x33   : > { %v257_v11 = vsub.f32 1.0, %v256_v10 }
  0x34   : > { %253 = vadd.xlane.f32.xlu0 %v252_v5  ;;  %p588_p13 = pneg %p587_p9 }
  0x35   : > { %v258_v12 = vmul.f32 %v534_v9, %v257_v11 }
  0x36   : > { %p593_p4 = pnand %p592_p3, %p588_p13 }
  0x37   : > { %v259_v13 = vadd.f32 %v534_v9, %v258_v12 }
  0x39   : > { %v261_v16 = vsel %vm260_vm0, %v534_v9, %v259_v13 }
  0x9f   : > { %v251_v14 = vpop.xlane.xlu0 %250 }
  0xa0   : > { %v262_v18 = vmul.f32 %v261_v16, %v251_v14 }
  0xa2   : > { %v271_v22 = vperm.slane %v262_v18, %v270_v17 }
  0xa7   : > { %v254_v20 = vpop.xlane.xlu0 %253 }
  0xa8   : > { %v263_v21 = vmul.f32 %v261_v16, %v254_v20 }
  0xaa   : > { %v273_v23 = vperm.slane %v263_v21, %v272_v19 }
  0xac   : > { %v275_v24 = vsel %vm274_vm1, %v273_v23, %v271_v22 }
  0xad   : > { %468 = vmatmul.msk.f32.vlgmr.msra.gmra.mxu0 %vm276_vm2, %v275_v24 }
 0x12a   : > { %v296_v27 = vpop.f32.mrf.mxu0 }
 0x12b   : > { %v297_v28 = vadd.f32 %v296_v27, %v266_v26 }
 0x12d   : > { %v299_v29 = vmax.f32 %v297_v28, 0.0 }
 0x12f   : > { %470 = vmatmul.msk.f32.vlgmr.msra.gmra.mxu1 %vm302_vm4, %v299_v29 }
 0x1ac   : > { %v327_v33 = vpop.f32.mrf.mxu1 }
 0x1ad   : > { %v328_v34 = vadd.f32 %v327_v33, %v301_v32 }
 0x1af   : > { %v471_v35 = vmul.f32 -1.442695, %v328_v34 }
 0x1b1   : > { %535 = vpow2.f32 %v471_v35 }
 0x1b7   : > { %v536_v36 = vpop.eup %535 }
 0x1b8   : > { %v333_v37 = vadd.f32 1.0, %v536_v36 }
 0x1ba   : > { %537 = vrcp.f32 %v333_v37  ;;  %v345_v41 = vand.u32 2147483648, %v333_v37  ;;  %v343_v43 = vand.u32 2147483647, %v333_v37  ;;  %vm339_vm6 = vweird.f32 %v333_v37 }
 0x1bc   : > { %v346_v45 = vor.u32 1.1754944e-38, %v345_v41  ;;  %vm344_vm8 = vcmp.eq.f32.partialorder %v343_v43, 8.507059e+37 }
 0x1c0   : > { %v538_v38 = vpop.eup %537 }
 0x1c1   : > { %v335_v39 = vmul.f32 %v538_v38, %v333_v37  ;;  %vm340_vm5 = vweird.f32 %v538_v38 }
 0x1c2   : > { %vm341_vm7 = vmor %vm339_vm6, %vm340_vm5 }
 0x1c3   : > { %v336_v40 = vsub.f32 1.0, %v335_v39 }
 0x1c5   : > { %v337_v42 = vmul.f32 %v538_v38, %v336_v40 }
 0x1c7   : > { %v338_v44 = vadd.f32 %v538_v38, %v337_v42 }
 0x1c9   : > { %v342_v46 = vsel %vm341_vm7, %v538_v38, %v338_v44 }
 0x1ca   : > { %v347_v47 = vsel %vm344_vm8, %v346_v45, %v342_v46 }
 0x1cb   : > { %v349_v48 = vperm.slane %v347_v47, 0 }
 0x1cd   : > { %354 = vperm.xlu1 %530, %v349_v48  }
 0x1d5   : > { %531 = vset.pattern.permute.xlu1 %v358_v31 }
 0x1dd   : > { %360 = vperm.xlu1 %531, %v349_v48  }
 0x23f   : > { %v355_v49 = vpop.permute.xlu1 %354 }
 0x240   : > { %v362_v50 = vmul.f32 %v355_v49, %v768_v0  ;;  %v363_v51 = vmul.f32 %v355_v49, %v770_v1 }
 0x242   : > { %366 = vst [vmem:[%s244_s7] sm:$0xff] %v362_v50 }
 0x243   : > { %367 = vst [vmem:[%s244_s7 + $0x8] sm:$0xff] %v363_v51 }
 0x24f   : > { %v361_v52 = vpop.permute.xlu1 %360 }
 0x250   : > { %v364_v53 = vmul.f32 %v361_v52, %v774_v3  ;;  %v365_v54 = vmul.f32 %v361_v52, %v776_v4 }
 0x252   : > { %368 = vst [vmem:[%s244_s7 + $0x10] sm:$0xff] %v364_v53 }
 0x253   : > { %369 = vst [vmem:[%s244_s7 + $0x18] sm:$0xff] %v365_v54 }
 0x254   : > { %596 = shalt.err (!%p593_p4)
}
 0x255   : > { %s640_s12 = smov 256   ;;  %s641_s10 = smov 16  }
 0x256   : > { %481 = dma.vmem_to_hbm [thread:$0]  (%p722_p11), %s384_s15, 512, %s386_s29, %s371_s14, %s640_s12, %s640_s12, %s641_s10  }
 0x257 PF: > { %s400_s7 = sand.u32 1, %s623_s18   ;;  %p845_p7 = scmp.ge.s32.totalorder %s635_s21, 2 }
 0x258   : > { %s401_s11 = scalar_lea.sflag [#allocation4], %s400_s7 }
 0x259   : > { %p488_p5 = pnand %p845_p7, %p726_p12 }
 0x25b   : > { %p489_p8 = pneg %p488_p5 }
 0x25d   : > { %618 = dma.done.wait (%p489_p8), %s401_s11, 512  }
 0x25e   : > { %620 = vsyncadd (%p489_p8), %s401_s11, 4294966784  ;;  %p18_p10 = scmp.ge.s32.totalorder %s697_s24, 4   ;;  %s846_s18 = smov %s627_s19 }
 0x25f   : > { %s847_s19 = smov %s631_s20  ;;  %s848_s20 = smov %s709_s27 }
 0x260   : > { %s849_s21 = smov %s697_s24  ;;  %20 = sbr.rel (!%p18_p10) target bundleno = 5 (0x5), region = 85 }
 0x265   :  { %407 = vsyncpa [#allocation3], 1 }
 0x266   :  { %409 = vsyncpa [#allocation3 + $0x1], 1 }
 0x267   :  { %410 = vsyncpa [#allocation4], 1 }
 0x268   :  { %412 = vsyncpa [#allocation4 + $0x1], 1 }

</bundles_post_ra>
